<compile_context>
chip_gen: v7x
topology: tpu7x:2x2x1
jax: 0.10.0
libtpu: 0.0.40
codegen_flags: <defaults>
</compile_context>

<pallas_src>
import jax
import jax.numpy as jnp
from jax.experimental import pallas as pl
from jax.experimental.pallas import tpu as pltpu


D_IN = 28 * 28  # 784
LAYER_DIMS = [(D_IN, 128), (128, 64), (64, 32), (32, 64), (64, 128), (128, D_IN)]


def _autoencoder_kernel(x_ref,
                        w1_ref, b1_ref,
                        w2_ref, b2_ref,
                        w3_ref, b3_ref,
                        w4_ref, b4_ref,
                        w5_ref, b5_ref,
                        w6_ref, b6_ref,
                        o_ref):
    """Fused 6-layer MLP on one (batch_tile, 784) tile.

    f32 input load, bf16 operands on the MXU, f32 accumulation / bias / ReLU /
    sigmoid, output stored in o_ref.dtype (f32 or bf16).
    """

    def dense(h_bf16, w_ref, b_ref):
        # bf16 x bf16 -> f32 accumulate on the MXU, f32 bias add on the VPU.
        return jnp.dot(h_bf16, w_ref[...],
                       preferred_element_type=jnp.float32) + b_ref[...]

    def relu_bf16(h_f32):
        # ReLU in f32, re-pack to bf16 for the next MXU pass.
        return jnp.maximum(h_f32, 0.0).astype(jnp.bfloat16)

    # Single f32 read of the input tile; cast to bf16 on the VPU (no wrapper
    # pad/cast prepass, no second HBM read of the input).
    h = x_ref[...].astype(jnp.bfloat16)              # (tb, 784)
    # Encoder
    h = relu_bf16(dense(h, w1_ref, b1_ref))          # (tb, 128)
    h = relu_bf16(dense(h, w2_ref, b2_ref))          # (tb, 64)
    h = relu_bf16(dense(h, w3_ref, b3_ref))          # (tb, 32)
    # Decoder
    h = relu_bf16(dense(h, w4_ref, b4_ref))          # (tb, 64)
    h = relu_bf16(dense(h, w5_ref, b5_ref))          # (tb, 128)
    z = dense(h, w6_ref, b6_ref)                     # (tb, 784) f32
    # sigmoid(z) = 1 / (1 + exp(-z)); exp and reciprocal both ride the EUP slot.
    o_ref[...] = pl.reciprocal(1.0 + jnp.exp(-z), approx=True).astype(o_ref.dtype)


def _round_up(x, m):
    return (x + m - 1) // m * m


def autoencoder_forward(x, params, *, batch_tile=1024,
                        compute_dtype=jnp.bfloat16, out_dtype=None):
    """x: (B, 784) float32. params: 6 (w, b) pairs (f32). Returns (B, 784).

    out_dtype defaults to x.dtype (f32, matching the PyTorch module). Pass
    jnp.bfloat16 to halve output HBM traffic when the consumer tolerates bf16.

    batch_tile guidance: 512-1024 on v5e, 1024-2048 on v6e, <=1024 on v7x
    (64 MiB VMEM / 2 TensorCores). It is clamped for small batches and B is
    padded to a multiple of 16, so no divisibility constraint on the caller.
    """
    B, D = x.shape
    assert D == D_IN
    if out_dtype is None:
        out_dtype = x.dtype

    # Row alignment: 16 (bf16 sublane pack) is all the MXU needs on the
    # streamed M dimension. Clamp the tile for small batches, and split into
    # >=2 grid steps when the batch would otherwise fit a single step so the
    # "parallel" axis can shard across v7x's two TensorCores.
    batch_tile = max(16, min(batch_tile, _round_up(B, 16)))
    if B > 32 and _round_up(B, 16) <= batch_tile:
        batch_tile = _round_up(-(-B // 2), 16)
    B_pad = _round_up(B, batch_tile)

    # Only the cheap batch-dim pad happens in the wrapper.
    x_pad = jnp.pad(x, ((0, B_pad - B), (0, 0))) if B_pad != B else x

    flat_params = []
    param_shapes = []
    for w, b in params:
        flat_params += [w.astype(compute_dtype), b.astype(jnp.float32)]
        param_shapes += [w.shape, b.shape]

    grid = (B_pad // batch_tile,)

    # Advisory cost estimate for the surrounding XLA schedule.
    flops_per_row = 2 * sum(din * dout for din, dout in LAYER_DIMS)
    param_bytes = sum(int(p.size) * p.dtype.itemsize for p in flat_params)
    out_itemsize = jnp.dtype(out_dtype).itemsize
    cost = pl.CostEstimate(
        flops=int(B_pad * flops_per_row),
        transcendentals=int(B_pad * D_IN),
        bytes_accessed=int(B_pad * D_IN * (x_pad.dtype.itemsize + out_itemsize)
                           + param_bytes))

    # Size the VMEM limit from the real tile footprint: double-buffered I/O
    # tiles + double-buffered params + headroom for in-kernel temporaries
    # (z, exp(-z), bf16 activations) and compiler scratch. Cap under v7x's
    # 64 MiB physical VMEM.
    in_tile_bytes = batch_tile * D_IN * x_pad.dtype.itemsize
    out_tile_bytes = batch_tile * D_IN * out_itemsize
    vmem_limit_bytes = int(2 * (in_tile_bytes + out_tile_bytes + param_bytes)
                           + 4 * batch_tile * D_IN * 4
                           + (8 << 20))
    vmem_limit_bytes = max(16 << 20, min(vmem_limit_bytes, 56 << 20))

    # Params are grid-invariant (constant index_map): Pallas does not re-DMA
    # them per step; default double buffering costs <1 MiB and keeps the code
    # simple.
    param_specs = [pl.BlockSpec(s, lambda i: (0, 0)) for s in param_shapes]

    out_pad = pl.pallas_call(
        _autoencoder_kernel,
        out_shape=jax.ShapeDtypeStruct((B_pad, D_IN), out_dtype),
        grid_spec=pltpu.PrefetchScalarGridSpec(
            num_scalar_prefetch=0,
            grid=grid,
            in_specs=[pl.BlockSpec((batch_tile, D_IN), lambda i: (i, 0))]
            + param_specs,
            out_specs=pl.BlockSpec((batch_tile, D_IN), lambda i: (i, 0)),
        ),
        compiler_params=pltpu.CompilerParams(
            dimension_semantics=("parallel",),
            vmem_limit_bytes=vmem_limit_bytes),
        cost_estimate=cost,
    )(x_pad, *flat_params)

    # Only a (cheap) row slice remains; no column slice, no extra full pass.
    return out_pad if B_pad == B else out_pad[:B]


def init_params(key):
    """Deterministic init matching the layer shapes in DenoisingAutoencoder."""
    params = []
    for din, dout in LAYER_DIMS:
        key, kw, kb = jax.random.split(key, 3)
        # PyTorch nn.Linear-style uniform(-1/sqrt(din), 1/sqrt(din)) init.
        bound = 1.0 / (din ** 0.5)
        w = jax.random.uniform(kw, (din, dout), jnp.float32, -bound, bound)
        b = jax.random.uniform(kb, (1, dout), jnp.float32, -bound, bound)
        params.append((w, b))
    return params


def reference_forward(x, params, compute_dtype=jnp.float32):
    """Pure-JAX reference. compute_dtype=bf16 mirrors the kernel's matmul dtype."""
    h = x
    last = len(params) - 1
    for i, (w, b) in enumerate(params):
        h = jnp.dot(h.astype(compute_dtype), w.astype(compute_dtype),
                    preferred_element_type=jnp.float32) + b
        if i < last:
            h = jnp.maximum(h, 0.0)
        else:
            h = jax.nn.sigmoid(h)
    return h


if __name__ == "__main__":
    key = jax.random.PRNGKey(0)
    kx, kp = jax.random.split(key)

    B = 8
    x = jax.random.uniform(kx, (B, D_IN), jnp.float32)  # flattened "images"
    params = init_params(kp)

    # Default (f32 output) path — matches the PyTorch module semantics.
    out = autoencoder_forward(x, params)
    out = jax.block_until_ready(out)
    assert out.shape == (B, D_IN)
    assert out.dtype == jnp.float32

    # Tight check vs a reference that mirrors the kernel arithmetic
    # (bf16 matmul operands, f32 accumulation); only MXU accumulation order and
    # the approximate reciprocal in the sigmoid differ.
    ref_bf16 = reference_forward(x, params, compute_dtype=jnp.bfloat16)
    err_bf16 = float(jnp.max(jnp.abs(out - ref_bf16)))
    assert err_bf16 < 1e-2, err_bf16

    # Loose check vs the full-f32 reference (bounds total bf16 rounding error).
    ref_f32 = reference_forward(x, params, compute_dtype=jnp.float32)
    err_f32 = float(jnp.max(jnp.abs(out - ref_f32)))
    assert err_f32 < 5e-2, err_f32

    # Optional bf16-output path (half the output HBM traffic); loose check only
    # since the store adds bf16 quantization of the sigmoid output.
    out_bf16 = jax.block_until_ready(
        autoencoder_forward(x, params, out_dtype=jnp.bfloat16))
    assert out_bf16.shape == (B, D_IN) and out_bf16.dtype == jnp.bfloat16
    err_out_bf16 = float(jnp.max(jnp.abs(out_bf16.astype(jnp.float32) - ref_bf16)))
    assert err_out_bf16 < 2e-2, err_out_bf16

    print("KERNEL_OK")
</pallas_src>

<mosaic_0001>
module attributes {stable_mosaic.version = 11 : i64} {
  func.func @_autoencoder_kernel(%arg0: i32, %arg1: memref<16x784xf32, #tpu.memory_space<vmem>>, %arg2: memref<784x128xbf16, #tpu.memory_space<vmem>>, %arg3: memref<1x128xf32, #tpu.memory_space<vmem>>, %arg4: memref<128x64xbf16, #tpu.memory_space<vmem>>, %arg5: memref<1x64xf32, #tpu.memory_space<vmem>>, %arg6: memref<64x32xbf16, #tpu.memory_space<vmem>>, %arg7: memref<1x32xf32, #tpu.memory_space<vmem>>, %arg8: memref<32x64xbf16, #tpu.memory_space<vmem>>, %arg9: memref<1x64xf32, #tpu.memory_space<vmem>>, %arg10: memref<64x128xbf16, #tpu.memory_space<vmem>>, %arg11: memref<1x128xf32, #tpu.memory_space<vmem>>, %arg12: memref<128x784xbf16, #tpu.memory_space<vmem>>, %arg13: memref<1x784xf32, #tpu.memory_space<vmem>>, %arg14: memref<16x784xf32, #tpu.memory_space<vmem>>) attributes {dimension_semantics = [#tpu.dimension_semantics<parallel>], iteration_bounds = array<i64: 1>, scalar_prefetch = 0 : i64, scratch_operands = 0 : i64, tpu.core_type = #tpu.core_type<tc>, window_params = [{transform_indices = @transform_0, window_bounds = array<i64: 16, 784>}, {pipeline_mode = #tpu.pipeline_mode<synchronous>, transform_indices = @transform_1, window_bounds = array<i64: 784, 128>}, {pipeline_mode = #tpu.pipeline_mode<synchronous>, transform_indices = @transform_2, window_bounds = array<i64: 1, 128>}, {pipeline_mode = #tpu.pipeline_mode<synchronous>, transform_indices = @transform_3, window_bounds = array<i64: 128, 64>}, {pipeline_mode = #tpu.pipeline_mode<synchronous>, transform_indices = @transform_4, window_bounds = array<i64: 1, 64>}, {pipeline_mode = #tpu.pipeline_mode<synchronous>, transform_indices = @transform_5, window_bounds = array<i64: 64, 32>}, {pipeline_mode = #tpu.pipeline_mode<synchronous>, transform_indices = @transform_6, window_bounds = array<i64: 1, 32>}, {pipeline_mode = #tpu.pipeline_mode<synchronous>, transform_indices = @transform_7, window_bounds = array<i64: 32, 64>}, {pipeline_mode = #tpu.pipeline_mode<synchronous>, transform_indices = @transform_8, window_bounds = array<i64: 1, 64>}, {pipeline_mode = #tpu.pipeline_mode<synchronous>, transform_indices = @transform_9, window_bounds = array<i64: 64, 128>}, {pipeline_mode = #tpu.pipeline_mode<synchronous>, transform_indices = @transform_10, window_bounds = array<i64: 1, 128>}, {pipeline_mode = #tpu.pipeline_mode<synchronous>, transform_indices = @transform_11, window_bounds = array<i64: 128, 784>}, {pipeline_mode = #tpu.pipeline_mode<synchronous>, transform_indices = @transform_12, window_bounds = array<i64: 1, 784>}, {transform_indices = @transform_13, window_bounds = array<i64: 16, 784>}]} {
    %c0 = arith.constant 0 : index
    %c0_0 = arith.constant 0 : index
    %0 = vector.load %arg1[%c0, %c0_0] : memref<16x784xf32, #tpu.memory_space<vmem>>, vector<16x784xf32>
    %1 = arith.truncf %0 : vector<16x784xf32> to vector<16x784xbf16>
    %c0_1 = arith.constant 0 : index
    %c0_2 = arith.constant 0 : index
    %2 = vector.load %arg2[%c0_1, %c0_2] : memref<784x128xbf16, #tpu.memory_space<vmem>>, vector<784x128xbf16>
    %cst = arith.constant dense<0.000000e+00> : vector<16x128xf32>
    %3 = tpu.matmul %1, %2, %cst {dimension_numbers = #tpu.dot_dimension_numbers<[1], [0], [0], [1], [0, 0, 1, 1], [], []>} : vector<16x784xbf16>, vector<784x128xbf16>, vector<16x128xf32> -> vector<16x128xf32>
    %c0_3 = arith.constant 0 : index
    %c0_4 = arith.constant 0 : index
    %4 = vector.load %arg3[%c0_3, %c0_4] : memref<1x128xf32, #tpu.memory_space<vmem>>, vector<1x128xf32>
    %5 = vector.broadcast %4 : vector<1x128xf32> to vector<16x128xf32>
    %6 = arith.addf %3, %5 : vector<16x128xf32>
    %cst_5 = arith.constant 0.000000e+00 : f32
    %7 = vector.broadcast %cst_5 : f32 to vector<16x128xf32>
    %8 = arith.maximumf %6, %7 : vector<16x128xf32>
    %9 = arith.truncf %8 : vector<16x128xf32> to vector<16x128xbf16>
    %c0_6 = arith.constant 0 : index
    %c0_7 = arith.constant 0 : index
    %10 = vector.load %arg4[%c0_6, %c0_7] : memref<128x64xbf16, #tpu.memory_space<vmem>>, vector<128x64xbf16>
    %cst_8 = arith.constant dense<0.000000e+00> : vector<16x64xf32>
    %11 = tpu.matmul %9, %10, %cst_8 {dimension_numbers = #tpu.dot_dimension_numbers<[1], [0], [0], [1], [0, 0, 1, 1], [], []>} : vector<16x128xbf16>, vector<128x64xbf16>, vector<16x64xf32> -> vector<16x64xf32>
    %c0_9 = arith.constant 0 : index
    %c0_10 = arith.constant 0 : index
    %12 = vector.load %arg5[%c0_9, %c0_10] : memref<1x64xf32, #tpu.memory_space<vmem>>, vector<1x64xf32>
    %13 = vector.broadcast %12 : vector<1x64xf32> to vector<16x64xf32>
    %14 = arith.addf %11, %13 : vector<16x64xf32>
    %cst_11 = arith.constant 0.000000e+00 : f32
    %15 = vector.broadcast %cst_11 : f32 to vector<16x64xf32>
    %16 = arith.maximumf %14, %15 : vector<16x64xf32>
    %17 = arith.truncf %16 : vector<16x64xf32> to vector<16x64xbf16>
    %c0_12 = arith.constant 0 : index
    %c0_13 = arith.constant 0 : index
    %18 = vector.load %arg6[%c0_12, %c0_13] : memref<64x32xbf16, #tpu.memory_space<vmem>>, vector<64x32xbf16>
    %cst_14 = arith.constant dense<0.000000e+00> : vector<16x32xf32>
    %19 = tpu.matmul %17, %18, %cst_14 {dimension_numbers = #tpu.dot_dimension_numbers<[1], [0], [0], [1], [0, 0, 1, 1], [], []>} : vector<16x64xbf16>, vector<64x32xbf16>, vector<16x32xf32> -> vector<16x32xf32>
    %c0_15 = arith.constant 0 : index
    %c0_16 = arith.constant 0 : index
    %20 = vector.load %arg7[%c0_15, %c0_16] : memref<1x32xf32, #tpu.memory_space<vmem>>, vector<1x32xf32>
    %21 = vector.broadcast %20 : vector<1x32xf32> to vector<16x32xf32>
    %22 = arith.addf %19, %21 : vector<16x32xf32>
    %cst_17 = arith.constant 0.000000e+00 : f32
    %23 = vector.broadcast %cst_17 : f32 to vector<16x32xf32>
    %24 = arith.maximumf %22, %23 : vector<16x32xf32>
    %25 = arith.truncf %24 : vector<16x32xf32> to vector<16x32xbf16>
    %c0_18 = arith.constant 0 : index
    %c0_19 = arith.constant 0 : index
    %26 = vector.load %arg8[%c0_18, %c0_19] : memref<32x64xbf16, #tpu.memory_space<vmem>>, vector<32x64xbf16>
    %cst_20 = arith.constant dense<0.000000e+00> : vector<16x64xf32>
    %27 = tpu.matmul %25, %26, %cst_20 {dimension_numbers = #tpu.dot_dimension_numbers<[1], [0], [0], [1], [0, 0, 1, 1], [], []>} : vector<16x32xbf16>, vector<32x64xbf16>, vector<16x64xf32> -> vector<16x64xf32>
    %c0_21 = arith.constant 0 : index
    %c0_22 = arith.constant 0 : index
    %28 = vector.load %arg9[%c0_21, %c0_22] : memref<1x64xf32, #tpu.memory_space<vmem>>, vector<1x64xf32>
    %29 = vector.broadcast %28 : vector<1x64xf32> to vector<16x64xf32>
    %30 = arith.addf %27, %29 : vector<16x64xf32>
    %cst_23 = arith.constant 0.000000e+00 : f32
    %31 = vector.broadcast %cst_23 : f32 to vector<16x64xf32>
    %32 = arith.maximumf %30, %31 : vector<16x64xf32>
    %33 = arith.truncf %32 : vector<16x64xf32> to vector<16x64xbf16>
    %c0_24 = arith.constant 0 : index
    %c0_25 = arith.constant 0 : index
    %34 = vector.load %arg10[%c0_24, %c0_25] : memref<64x128xbf16, #tpu.memory_space<vmem>>, vector<64x128xbf16>
    %cst_26 = arith.constant dense<0.000000e+00> : vector<16x128xf32>
    %35 = tpu.matmul %33, %34, %cst_26 {dimension_numbers = #tpu.dot_dimension_numbers<[1], [0], [0], [1], [0, 0, 1, 1], [], []>} : vector<16x64xbf16>, vector<64x128xbf16>, vector<16x128xf32> -> vector<16x128xf32>
    %c0_27 = arith.constant 0 : index
    %c0_28 = arith.constant 0 : index
    %36 = vector.load %arg11[%c0_27, %c0_28] : memref<1x128xf32, #tpu.memory_space<vmem>>, vector<1x128xf32>
    %37 = vector.broadcast %36 : vector<1x128xf32> to vector<16x128xf32>
    %38 = arith.addf %35, %37 : vector<16x128xf32>
    %cst_29 = arith.constant 0.000000e+00 : f32
    %39 = vector.broadcast %cst_29 : f32 to vector<16x128xf32>
    %40 = arith.maximumf %38, %39 : vector<16x128xf32>
    %41 = arith.truncf %40 : vector<16x128xf32> to vector<16x128xbf16>
    %c0_30 = arith.constant 0 : index
    %c0_31 = arith.constant 0 : index
    %42 = vector.load %arg12[%c0_30, %c0_31] : memref<128x784xbf16, #tpu.memory_space<vmem>>, vector<128x784xbf16>
    %cst_32 = arith.constant dense<0.000000e+00> : vector<16x784xf32>
    %43 = tpu.matmul %41, %42, %cst_32 {dimension_numbers = #tpu.dot_dimension_numbers<[1], [0], [0], [1], [0, 0, 1, 1], [], []>} : vector<16x128xbf16>, vector<128x784xbf16>, vector<16x784xf32> -> vector<16x784xf32>
    %c0_33 = arith.constant 0 : index
    %c0_34 = arith.constant 0 : index
    %44 = vector.load %arg13[%c0_33, %c0_34] : memref<1x784xf32, #tpu.memory_space<vmem>>, vector<1x784xf32>
    %45 = vector.broadcast %44 : vector<1x784xf32> to vector<16x784xf32>
    %46 = arith.addf %43, %45 : vector<16x784xf32>
    %cst_35 = arith.constant 0.000000e+00 : f32
    %47 = vector.broadcast %cst_35 : f32 to vector<16x784xf32>
    %48 = arith.subf %47, %46 : vector<16x784xf32>
    %49 = math.exp %48 : vector<16x784xf32>
    %cst_36 = arith.constant 1.000000e+00 : f32
    %50 = vector.broadcast %cst_36 : f32 to vector<16x784xf32>
    %51 = arith.addf %50, %49 : vector<16x784xf32>
    %52 = tpu.reciprocal %51 {approx = true} : vector<16x784xf32> -> vector<16x784xf32>
    %c0_37 = arith.constant 0 : index
    %c0_38 = arith.constant 0 : index
    %53 = vector.load %arg14[%c0_37, %c0_38] : memref<16x784xf32, #tpu.memory_space<vmem>>, vector<16x784xf32>
    tpu.vector_store %arg14[%c0_37, %c0_38], %52 {strides = array<i32>} : memref<16x784xf32, #tpu.memory_space<vmem>>, vector<16x784xf32>,
    return
  }
  func.func @transform_0(%arg0: i32) -> (i32, i32) {
    %c0_i32 = arith.constant 0 : i32
    %c0_i32_0 = arith.constant 0 : i32
    return %arg0, %c0_i32 : i32, i32
  }
  func.func @transform_1(%arg0: i32) -> (i32, i32) {
    %c0_i32 = arith.constant 0 : i32
    %c0_i32_0 = arith.constant 0 : i32
    %c0_i32_1 = arith.constant 0 : i32
    return %c0_i32, %c0_i32_0 : i32, i32
  }
  func.func @transform_2(%arg0: i32) -> (i32, i32) {
    %c0_i32 = arith.constant 0 : i32
    %c0_i32_0 = arith.constant 0 : i32
    %c0_i32_1 = arith.constant 0 : i32
    return %c0_i32, %c0_i32_0 : i32, i32
  }
  func.func @transform_3(%arg0: i32) -> (i32, i32) {
    %c0_i32 = arith.constant 0 : i32
    %c0_i32_0 = arith.constant 0 : i32
    %c0_i32_1 = arith.constant 0 : i32
    return %c0_i32, %c0_i32_0 : i32, i32
  }
  func.func @transform_4(%arg0: i32) -> (i32, i32) {
    %c0_i32 = arith.constant 0 : i32
    %c0_i32_0 = arith.constant 0 : i32
    %c0_i32_1 = arith.constant 0 : i32
    return %c0_i32, %c0_i32_0 : i32, i32
  }
  func.func @transform_5(%arg0: i32) -> (i32, i32) {
    %c0_i32 = arith.constant 0 : i32
    %c0_i32_0 = arith.constant 0 : i32
    %c0_i32_1 = arith.constant 0 : i32
    return %c0_i32, %c0_i32_0 : i32, i32
  }
  func.func @transform_6(%arg0: i32) -> (i32, i32) {
    %c0_i32 = arith.constant 0 : i32
    %c0_i32_0 = arith.constant 0 : i32
    %c0_i32_1 = arith.constant 0 : i32
    return %c0_i32, %c0_i32_0 : i32, i32
  }
  func.func @transform_7(%arg0: i32) -> (i32, i32) {
    %c0_i32 = arith.constant 0 : i32
    %c0_i32_0 = arith.constant 0 : i32
    %c0_i32_1 = arith.constant 0 : i32
    return %c0_i32, %c0_i32_0 : i32, i32
  }
  func.func @transform_8(%arg0: i32) -> (i32, i32) {
    %c0_i32 = arith.constant 0 : i32
    %c0_i32_0 = arith.constant 0 : i32
    %c0_i32_1 = arith.constant 0 : i32
    return %c0_i32, %c0_i32_0 : i32, i32
  }
  func.func @transform_9(%arg0: i32) -> (i32, i32) {
    %c0_i32 = arith.constant 0 : i32
    %c0_i32_0 = arith.constant 0 : i32
    %c0_i32_1 = arith.constant 0 : i32
    return %c0_i32, %c0_i32_0 : i32, i32
  }
  func.func @transform_10(%arg0: i32) -> (i32, i32) {
    %c0_i32 = arith.constant 0 : i32
    %c0_i32_0 = arith.constant 0 : i32
    %c0_i32_1 = arith.constant 0 : i32
    return %c0_i32, %c0_i32_0 : i32, i32
  }
  func.func @transform_11(%arg0: i32) -> (i32, i32) {
    %c0_i32 = arith.constant 0 : i32
    %c0_i32_0 = arith.constant 0 : i32
    %c0_i32_1 = arith.constant 0 : i32
    return %c0_i32, %c0_i32_0 : i32, i32
  }
  func.func @transform_12(%arg0: i32) -> (i32, i32) {
    %c0_i32 = arith.constant 0 : i32
    %c0_i32_0 = arith.constant 0 : i32
    %c0_i32_1 = arith.constant 0 : i32
    return %c0_i32, %c0_i32_0 : i32, i32
  }
  func.func @transform_13(%arg0: i32) -> (i32, i32) {
    %c0_i32 = arith.constant 0 : i32
    %c0_i32_0 = arith.constant 0 : i32
    return %arg0, %c0_i32 : i32, i32
  }
}

</mosaic_0001>

<bundles_post_ra>
// kernel: tpu_custom_call.1
= control target key start
LH: loop header
LB: loop body
LE: loop exit
PB: predicated region body
PF: predicated region fallthrough
CT: control target
= control target key end

     0   :  { %v2197_v43 = vmov 0.0   ;;  %vm2198_vm0 = vmmov 0   ;;  %vm466_vm1 = vcmask 130048   ;;  %s2776_s0 = inlined_call_operand.vmem [shape: f32[16,784], index: 0, kind: input, shape index: {}]   ;;  %s2777_s1 = inlined_call_operand.vmem [shape: bf16[784,128], index: 1, kind: input, shape index: {}]   ;;  %s2778_s2 = inlined_call_operand.vmem [shape: f32[1,128], index: 2, kind: input, shape index: {}]   ;;  %s2779_s3 = inlined_call_operand.vmem [shape: bf16[128,64], index: 3, kind: input, shape index: {}]   ;;  %s2780_s4 = inlined_call_operand.vmem [shape: f32[1,64], index: 4, kind: input, shape index: {}]   ;;  %s2781_s5 = inlined_call_operand.vmem [shape: bf16[64,32], index: 5, kind: input, shape index: {}]   ;;  %s2782_s6 = inlined_call_operand.vmem [shape: f32[1,32], index: 6, kind: input, shape index: {}]   ;;  %s2783_s7 = inlined_call_operand.vmem [shape: bf16[32,64], index: 7, kind: input, shape index: {}]   ;;  %s2784_s8 = inlined_call_operand.vmem [shape: f32[1,64], index: 8, kind: input, shape index: {}]   ;;  %s2785_s9 = inlined_call_operand.vmem [shape: bf16[64,128], index: 9, kind: input, shape index: {}]   ;;  %s2786_s10 = inlined_call_operand.vmem [shape: f32[1,128], index: 10, kind: input, shape index: {}]   ;;  %s2787_s11 = inlined_call_operand.vmem [shape: bf16[128,784], index: 11, kind: input, shape index: {}]   ;;  %s2788_s12 = inlined_call_operand.vmem [shape: f32[1,784], index: 12, kind: input, shape index: {}]   ;;  %s2789_s13 = inlined_call_operand.hbm [shape: f32[16,784], index: 13, kind: output, shape index: {}]  }
   0x1   :  { %v1970_v0 = vld [vmem:[%s2777_s1 + $0x40] sm:$0xff]   ;;  %v1974_v4 = vld [vmem:[%s2777_s1 + $0x48] sm:$0xff]   ;;  %v1978_v8 = vld [vmem:[%s2777_s1 + $0x50] sm:$0xff]  }
   0x2   :  { %v1971_v1 = vld [vmem:[%s2777_s1] sm:$0xff]   ;;  %1787 = vmatprep.subr.bf16.mxu0 %v1970_v0  ;;  %v1975_v5 = vld [vmem:[%s2777_s1 + $0x8] sm:$0xff]   ;;  %v1979_v9 = vld [vmem:[%s2777_s1 + $0x10] sm:$0xff]  }
   0x3   :  { %v1972_v2 = vld [vmem:[%s2777_s1 + $0xc0] sm:$0xff]   ;;  %1788 = vmatpush3.bf16.msra.mxu0 %v1971_v1  ;;  %v1976_v6 = vld [vmem:[%s2777_s1 + $0xc8] sm:$0xff]   ;;  %v1980_v10 = vld [vmem:[%s2777_s1 + $0xd0] sm:$0xff]  }
   0x4   :  { %v1973_v3 = vld [vmem:[%s2777_s1 + $0x80] sm:$0xff]   ;;  %1809 = vmatprep.subr.bf16.mxu1 %v1972_v2  ;;  %1789 = vmatprep.subr.bf16.mxu0 %v1974_v4  ;;  %v1977_v7 = vld [vmem:[%s2777_s1 + $0x88] sm:$0xff]   ;;  %v1981_v11 = vld [vmem:[%s2777_s1 + $0x90] sm:$0xff]  }
   0x5   :  { %1810 = vmatpush3.bf16.msra.mxu1 %v1973_v3  ;;  %v1982_v12 = vld [vmem:[%s2777_s1 + $0x58] sm:$0xff]   ;;  %v1986_v16 = vld [vmem:[%s2777_s1 + $0x60] sm:$0xff]   ;;  %v1990_v20 = vld [vmem:[%s2777_s1 + $0x68] sm:$0xff]  }
   0x6   :  { %1811 = vmatprep.subr.bf16.mxu1 %v1976_v6  ;;  %v1983_v13 = vld [vmem:[%s2777_s1 + $0x18] sm:$0xff]   ;;  %v1987_v17 = vld [vmem:[%s2777_s1 + $0x20] sm:$0xff]   ;;  %v1991_v21 = vld [vmem:[%s2777_s1 + $0x28] sm:$0xff]  }
   0x7   :  { %1790 = vmatpush3.bf16.msra.mxu0 %v1975_v5  ;;  %v1984_v14 = vld [vmem:[%s2777_s1 + $0xd8] sm:$0xff]   ;;  %v1988_v18 = vld [vmem:[%s2777_s1 + $0xe0] sm:$0xff]   ;;  %v1992_v22 = vld [vmem:[%s2777_s1 + $0xe8] sm:$0xff]  }
   0x8   :  { %1791 = vmatprep.subr.bf16.mxu0 %v1978_v8  ;;  %v1985_v15 = vld [vmem:[%s2777_s1 + $0x98] sm:$0xff]   ;;  %v1989_v19 = vld [vmem:[%s2777_s1 + $0xa0] sm:$0xff]   ;;  %v1993_v23 = vld [vmem:[%s2777_s1 + $0xa8] sm:$0xff]  }
   0x9   :  { %1812 = vmatpush3.bf16.msra.mxu1 %v1977_v7  ;;  %v1994_v24 = vld [vmem:[%s2777_s1 + $0x70] sm:$0xff]   ;;  %v1998_v28 = vld [vmem:[%s2777_s1 + $0x78] sm:$0xff]   ;;  %v47_v31 = vld [vmem:[%s2776_s0 + $0x8] sm:$0xff] }
   0xa   :  { %1813 = vmatprep.subr.bf16.mxu1 %v1980_v10  ;;  %v1995_v25 = vld [vmem:[%s2777_s1 + $0x30] sm:$0xff]   ;;  %v1999_v29 = vld [vmem:[%s2777_s1 + $0x38] sm:$0xff]   ;;  %v54_v32 = vld [vmem:[%s2776_s0 + $0x40] sm:$0xff] }
   0xb   :  { %1792 = vmatpush3.bf16.msra.mxu0 %v1979_v9  ;;  %v1996_v26 = vld [vmem:[%s2777_s1 + $0xf0] sm:$0xff]   ;;  %v2000_v30 = vld [vmem:[%s2777_s1 + $0xf8] sm:$0xff]   ;;  %v61_v33 = vpack.c.bf16 %v54_v32, %v47_v31  ;;  %v46_v35 = vld [vmem:[%s2776_s0] sm:$0xff] }
   0xc   :  { %1793 = vmatprep.subr.bf16.mxu0 %v1982_v12  ;;  %v1997_v27 = vld [vmem:[%s2777_s1 + $0xb0] sm:$0xff]   ;;  %v2001_v34 = vld [vmem:[%s2777_s1 + $0xb8] sm:$0xff]   ;;  %v2002_v38 = vld [vmem:[%s2777_s1 + $0x140] sm:$0xff]  }
   0xd   :  { %1814 = vmatpush3.bf16.msra.mxu1 %v1981_v11  ;;  %v53_v36 = vld [vmem:[%s2776_s0 + $0x38] sm:$0xff]  ;;  %502 = vmatprep.mubr.bf16.mxu0 %v61_v33  ;;  %v56_v40 = vld [vmem:[%s2776_s0 + $0x50] sm:$0xff]  ;;  %v2003_v42 = vld [vmem:[%s2777_s1 + $0x100] sm:$0xff]  }
   0xe   :  { %1815 = vmatprep.subr.bf16.mxu1 %v1984_v14  ;;  %v60_v37 = vpack.c.bf16 %v53_v36, %v46_v35  ;;  %v49_v39 = vld [vmem:[%s2776_s0 + $0x18] sm:$0xff]  ;;  %v48_v44 = vld [vmem:[%s2776_s0 + $0x10] sm:$0xff]  ;;  %v55_v45 = vld [vmem:[%s2776_s0 + $0x48] sm:$0xff] }
   0xf   :  { %1794 = vmatpush3.bf16.msra.mxu0 %v1983_v13  ;;  %v63_v41 = vpack.c.bf16 %v56_v40, %v49_v39  ;;  %v62_v46 = vpack.c.bf16 %v55_v45, %v48_v44  ;;  %v2004_v47 = vld [vmem:[%s2777_s1 + $0x148] sm:$0xff]   ;;  %v2006_v49 = vld [vmem:[%s2777_s1 + $0x150] sm:$0xff]   ;;  %v2008_v51 = vld [vmem:[%s2777_s1 + $0x158] sm:$0xff]  }
  0x10   :  { %1795 = vmatprep.subr.bf16.mxu0 %v1986_v16  ;;  %v2005_v48 = vld [vmem:[%s2777_s1 + $0x108] sm:$0xff]   ;;  %v2007_v50 = vld [vmem:[%s2777_s1 + $0x110] sm:$0xff]   ;;  %v2009_v52 = vld [vmem:[%s2777_s1 + $0x118] sm:$0xff]  }
  0x11   :  { %1816 = vmatpush3.bf16.msra.mxu1 %v1985_v15  ;;  %543 = vmatprep.mubr.bf16.mxu1 %v63_v41  ;;  %v2010_v53 = vld [vmem:[%s2777_s1 + $0x160] sm:$0xff]   ;;  %v2012_v55 = vld [vmem:[%s2777_s1 + $0x168] sm:$0xff]   ;;  %v2014_v59 = vld [vmem:[%s2777_s1 + $0x170] sm:$0xff]  }
  0x12   :  { %1817 = vmatprep.subr.bf16.mxu1 %v1988_v18  ;;  %v2011_v54 = vld [vmem:[%s2777_s1 + $0x120] sm:$0xff]   ;;  %v51_v57 = vld [vmem:[%s2776_s0 + $0x28] sm:$0xff]  ;;  %v52_v62 = vld [vmem:[%s2776_s0 + $0x30] sm:$0xff] }
  0x13   :  { %1796 = vmatpush3.bf16.msra.mxu0 %v1987_v17  ;;  %v2018_v56 = vld [vmem:[%s2777_s1 + $0x180] sm:$0xff]   ;;  %v2013_v58 = vld [vmem:[%s2777_s1 + $0x128] sm:$0xff]   ;;  %v2015_v1 = vld [vmem:[%s2777_s1 + $0x130] sm:$0xff]  }
  0x14   :  { %1797 = vmatprep.subr.bf16.mxu0 %v1990_v20  ;;  %v58_v60 = vld [vmem:[%s2776_s0 + $0x60] sm:$0xff]  ;;  %v59_v63 = vld [vmem:[%s2776_s0 + $0x68] sm:$0xff]  ;;  %v2016_v2 = vld [vmem:[%s2777_s1 + $0x178] sm:$0xff]  }
  0x15   :  { %1818 = vmatpush3.bf16.msra.mxu1 %v1989_v19  ;;  %v65_v61 = vpack.c.bf16 %v58_v60, %v51_v57  ;;  %v66_v0 = vpack.c.bf16 %v59_v63, %v52_v62  ;;  %v2017_v3 = vld [vmem:[%s2777_s1 + $0x138] sm:$0xff]   ;;  %v50_v4 = vld [vmem:[%s2776_s0 + $0x20] sm:$0xff] }
  0x16   :  { %1819 = vmatprep.subr.bf16.mxu1 %v1992_v22  ;;  %v57_v5 = vld [vmem:[%s2776_s0 + $0x58] sm:$0xff] }
  0x17   :  { %1798 = vmatpush3.bf16.msra.mxu0 %v1991_v21  ;;  %v64_v6 = vpack.c.bf16 %v57_v5, %v50_v4 }
  0x18   :  { %1799 = vmatprep.subr.bf16.mxu0 %v1994_v24 }
  0x19   :  { %1820 = vmatpush3.bf16.msra.mxu1 %v1993_v23 }
  0x1a   :  { %1821 = vmatprep.subr.bf16.mxu1 %v1996_v26 }
  0x1b   :  { %1800 = vmatpush3.bf16.msra.mxu0 %v1995_v25 }
  0x1c   :  { %1801 = vmatprep.subr.bf16.mxu0 %v1998_v28 }
  0x1d   :  { %1822 = vmatpush3.bf16.msra.mxu1 %v1997_v27 }
  0x1e   :  { %1823 = vmatprep.subr.bf16.mxu1 %v2000_v30 }
  0x1f   :  { %1802 = vmatpush3.bf16.msra.mxu0 %v1999_v29 }
  0x20   :  { %1831 = vmatprep.subr.bf16.mxu0 %v2002_v38 }
  0x21   :  { %1824 = vmatpush3.bf16.msra.mxu1 %v2001_v34 }
  0x22   :  { %1886 = vmatprep.subr.bf16.mxu1 %v2197_v43  ;;  %503 = vmatmul.mubr.bf16.vlgmr.msra.gmra.mrb[0].mxu0 %v60_v37 }
  0x23   :  { %1832 = vmatpush3.bf16.msra.mxu0 %v2003_v42  ;;  %584 = vmatprep.mubr.bf16.mxu0 %v65_v61 }
  0x24   :  { %544 = vmatmul.mubr.bf16.vlgmr.msra.gmra.mrb[0].mxu1 %v62_v46  ;;  %1833 = vmatprep.subr.bf16.mxu0 %v2004_v47 }
  0x25   :  { %1888 = vmatprep.mubr.msk.bf16.mxu1 %vm2198_vm0, %v2197_v43  ;;  %1887 = vmatpush3.bf16.msra.mxu1 %v2018_v56 }
  0x26   :  { %1892 = vmatprep.subr.bf16.mxu1 %v2197_v43 }
  0x27   :  { %1834 = vmatpush3.bf16.msra.mxu0 %v2005_v48 }
  0x28   :  { %1835 = vmatprep.subr.bf16.mxu0 %v2006_v49 }
  0x2b   :  { %1836 = vmatpush3.bf16.msra.mxu0 %v2007_v50 }
  0x2c   :  { %1837 = vmatprep.subr.bf16.mxu0 %v2008_v51  ;;  %1889 = vmatmul.mubr.msk.bf16.vlgmr.msra.gmra.mrb[4].mxu1 %vm466_vm1, %v66_v0 }
  0x2d   :  { %1908 = vmatprep.mubr.msk.bf16.mxu1 %vm2198_vm0, %v2197_v43 }
  0x2f   :  { %1838 = vmatpush3.bf16.msra.mxu0 %v2009_v52 }
  0x30   :  { %1839 = vmatprep.subr.bf16.mxu0 %v2010_v53 }
  0x33   :  { %1840 = vmatpush3.bf16.msra.mxu0 %v2011_v54 }
  0x34   :  { %1841 = vmatprep.subr.bf16.mxu0 %v2012_v55 }
  0x37   :  { %1842 = vmatpush3.bf16.msra.mxu0 %v2013_v58 }
  0x38   :  { %1843 = vmatprep.subr.bf16.mxu0 %v2014_v59 }
  0x3b   :  { %1844 = vmatpush3.bf16.msra.mxu0 %v2015_v1 }
  0x3c   :  { %1845 = vmatprep.subr.bf16.mxu0 %v2016_v2 }
  0x3f   :  { %1846 = vmatpush3.bf16.msra.mxu0 %v2017_v3 }
  0x40   :  { %1912 = vmatprep.subr.bf16.mxu0 %v2197_v43 }
  0x42   :  { %585 = vmatmul.mubr.bf16.vlgmr.msra.gmra.mrb[4].mxu0 %v64_v6 }
  0x43   :  { %1920 = vmatprep.mubr.msk.bf16.mxu0 %vm2198_vm0, %v2197_v43 }
  0x44   :  { %18 = vsyncpa [#allocation3], 0  ;;  %v2019_v7 = vld [vmem:[%s2779_s3] sm:$0xff]   ;;  %v2020_v8 = vld [vmem:[%s2779_s3 + $0x8] sm:$0xff]   ;;  %vm791_vm2 = vcmask 523264   ;;  %vm862_vm3 = vcmask 261120  }
  0x45   :  { %1893 = vmatpush3.bf16.msra.mxu1 %v2019_v7  ;;  %v2021_v9 = vld [vmem:[%s2779_s3 + $0x10] sm:$0xff]   ;;  %v2022_v10 = vld [vmem:[%s2779_s3 + $0x18] sm:$0xff]   ;;  %v2023_v11 = vld [vmem:[%s2779_s3 + $0x20] sm:$0xff]  }
  0x46   :  { %1894 = vmatprep.subr.bf16.mxu1 %v2197_v43  ;;  %v2024_v12 = vld [vmem:[%s2779_s3 + $0x28] sm:$0xff]   ;;  %v2025_v13 = vld [vmem:[%s2779_s3 + $0x30] sm:$0xff]   ;;  %v2026_v14 = vld [vmem:[%s2779_s3 + $0x38] sm:$0xff]  }
  0x47   :  { %v2027_v15 = vld [vmem:[%s2781_s5] sm:$0xff]   ;;  %v2028_v16 = vld [vmem:[%s2781_s5 + $0x8] sm:$0xff]   ;;  %v2029_v52 = vld [vmem:[%s2781_s5 + $0x10] sm:$0xff]  }
  0x48   :  { %1913 = vmatpush3.bf16.msra.mxu0 %v2027_v15  ;;  %v1655_v18 = vld [vmem:[%s2778_s2] ss:$0 sm:$0xff]  ;;  %v2030_v53 = vld [vmem:[%s2781_s5 + $0x18] sm:$0xff]   ;;  %v2032_v1 = vld [vmem:[%s2783_s7 + $0x8] sm:$0xff]  }
  0x49   :  { %1895 = vmatpush3.bf16.msra.mxu1 %v2020_v8  ;;  %1914 = vmatprep.subr.bf16.mxu0 %v2197_v43  ;;  %v1706_v54 = vld [vmem:[%s2780_s4] ss:$0 sm:$0xff]  ;;  %v2034_v3 = vld [vmem:[%s2785_s9 + $0x8] sm:$0xff]   ;;  %v2036_v15 = vld [vmem:[%s2785_s9 + $0x18] sm:$0xff]  }
  0x4a   :  { %1896 = vmatprep.subr.bf16.mxu1 %v2197_v43  ;;  %v2031_v0 = vld [vmem:[%s2783_s7] sm:$0xff]  }
  0x4b   :  { %v2033_v2 = vld [vmem:[%s2785_s9] sm:$0xff]  }
  0x4c   :  { %1915 = vmatpush3.bf16.msra.mxu0 %v2028_v16  ;;  %v1715_v4 = vld [vmem:[%s2782_s6] ss:$0 sm:$0xff] }
  0x4d   :  { %1897 = vmatpush3.bf16.msra.mxu1 %v2021_v9  ;;  %1916 = vmatprep.subr.bf16.mxu0 %v2197_v43  ;;  %v2037_v16 = vld [vmem:[%s2787_s11] ss:$28 sps:$4 sm:$0xff]  }
  0x4e   :  { %1898 = vmatprep.subr.bf16.mxu1 %v2197_v43 }
  0x50   :  { %1917 = vmatpush3.bf16.msra.mxu0 %v2029_v52  ;;  %v2078_v52 = vld [vmem:[%s2787_s11 + $0x15c] ss:$28 sps:$4 sm:$0xff]  }
  0x51   :  { %1899 = vmatpush3.bf16.msra.mxu1 %v2022_v10  ;;  %1918 = vmatprep.subr.bf16.mxu0 %v2197_v43 }
  0x52   :  { %1900 = vmatprep.subr.bf16.mxu1 %v2197_v43 }
  0x54   :  { %1919 = vmatpush3.bf16.msra.mxu0 %v2030_v53  ;;  %v2073_v53 = vld [vmem:[%s2787_s11 + $0x150] ss:$28 sps:$4 sm:$0xff]  }
  0x55   :  { %1901 = vmatpush3.bf16.msra.mxu1 %v2023_v11  ;;  %1932 = vmatprep.subr.bf16.mxu0 %v2197_v43 }
  0x56   :  { %1902 = vmatprep.subr.bf16.mxu1 %v2197_v43 }
  0x59   :  { %1903 = vmatpush3.bf16.msra.mxu1 %v2024_v12 }
  0x5a   :  { %1904 = vmatprep.subr.bf16.mxu1 %v2197_v43 }
  0x5d   :  { %1905 = vmatpush3.bf16.msra.mxu1 %v2025_v13 }
  0x5e   :  { %1906 = vmatprep.subr.bf16.mxu1 %v2197_v43 }
  0x61   :  { %1907 = vmatpush3.bf16.msra.mxu1 %v2026_v14  ;;  %v2035_v14 = vld [vmem:[%s2785_s9 + $0x10] sm:$0xff]  }
  0x62   :  { %1924 = vmatprep.subr.bf16.mxu1 %v2197_v43 }
  0xf5   :  { %v1803_v17 = vpop.f32.mrb[0].mxu0 }
  0xf6   :  { %v1804_v19 = vpop.f32.mrb[1].mxu0 }
  0xf7   :  { %v1805_v20 = vadd.f32 %v1804_v19, %v1803_v17  ;;  %v1806_v21 = vpop.f32.mrb[2].mxu0  ;;  %v1825_v22 = vpop.f32.mrb[0].mxu1  ;;  %v2039_v17 = vld [vmem:[%s2787_s11 + $0x4] ss:$28 sps:$4 sm:$0xff]   ;;  %v2045_v19 = vld [vmem:[%s2787_s11 + $0x3c] ss:$28 sps:$4 sm:$0xff]  }
  0xf8   :  { %v1807_v23 = vpop.f32.mrb[3].mxu0  ;;  %v1826_v26 = vpop.f32.mrb[1].mxu1 }
  0xf9   :  { %v505_v24 = vadd.f32 %v1805_v20, %v1655_v18  ;;  %v1808_v25 = vadd.f32 %v1807_v23, %v1806_v21  ;;  %v1827_v27 = vadd.f32 %v1826_v26, %v1825_v22  ;;  %v1828_v28 = vpop.f32.mrb[2].mxu1  ;;  %v2043_v20 = vld [vmem:[%s2787_s11 + $0x38] ss:$28 sps:$4 sm:$0xff]   ;;  %v2049_v22 = vld [vmem:[%s2787_s11 + $0x70] ss:$28 sps:$4 sm:$0xff]  }
  0xfa   :  { %v1829_v30 = vpop.f32.mrb[3].mxu1  ;;  %v2051_v21 = vld [vmem:[%s2787_s11 + $0x74] ss:$28 sps:$4 sm:$0xff]   ;;  %v2057_v23 = vld [vmem:[%s2787_s11 + $0xac] ss:$28 sps:$4 sm:$0xff]  }
  0xfb   :  { %v508_v29 = vadd.f32 %v1808_v25, %v1655_v18  ;;  %v546_v31 = vadd.f32 %v1827_v27, %v505_v24  ;;  %v1830_v32 = vadd.f32 %v1829_v30, %v1828_v28  ;;  %v2042_v18 = vld [vmem:[%s2787_s11 + $0xc] ss:$28 sps:$4 sm:$0xff]   ;;  %v2063_v25 = vld [vmem:[%s2787_s11 + $0xe4] ss:$28 sps:$4 sm:$0xff]   ;;  %v2069_v27 = vld [vmem:[%s2787_s11 + $0x11c] ss:$28 sps:$4 sm:$0xff]  }
  0xfc   :  { %v2055_v24 = vld [vmem:[%s2787_s11 + $0xa8] ss:$28 sps:$4 sm:$0xff]   ;;  %v2061_v26 = vld [vmem:[%s2787_s11 + $0xe0] ss:$28 sps:$4 sm:$0xff]   ;;  %v2067_v28 = vld [vmem:[%s2787_s11 + $0x118] ss:$28 sps:$4 sm:$0xff]  }
  0xfd   :  { %v549_v33 = vadd.f32 %v1830_v32, %v508_v29  ;;  %v1721_v29 = vld [vmem:[%s2784_s8] ss:$0 sm:$0xff] }
  0xff   :  { %v627_v34 = vpop.f32.mrb[4].mxu1 }
 0x100   :  { %v1890_v35 = vpop.f32.mrb[5].mxu1 }
 0x101   :  { %v630_v36 = vpop.f32.mrb[6].mxu1 }
 0x102   :  { %v1891_v37 = vpop.f32.mrb[7].mxu1 }
 0x115   :  { %v1847_v38 = vpop.f32.mrb[4].mxu0 }
 0x116   :  { %v1848_v39 = vpop.f32.mrb[5].mxu0 }
 0x117   :  { %v1849_v40 = vadd.f32 %v1848_v39, %v1847_v38  ;;  %v1850_v41 = vpop.f32.mrb[6].mxu0  ;;  %v2040_v38 = vld [vmem:[%s2787_s11 + $0x8] ss:$28 sps:$4 sm:$0xff]  }
 0x118   :  { %v1851_v42 = vpop.f32.mrb[7].mxu0 }
 0x119   :  { %v587_v44 = vadd.f32 %v1849_v40, %v546_v31  ;;  %v1852_v45 = vadd.f32 %v1851_v42, %v1850_v41  ;;  %v2048_v40 = vld [vmem:[%s2787_s11 + $0x44] ss:$28 sps:$4 sm:$0xff]   ;;  %v2054_v42 = vld [vmem:[%s2787_s11 + $0x7c] ss:$28 sps:$4 sm:$0xff]  }
 0x11a   :  { %v2046_v41 = vld [vmem:[%s2787_s11 + $0x40] ss:$28 sps:$4 sm:$0xff]  }
 0x11b   :  { %v628_v46 = vadd.f32 %v627_v34, %v587_v44  ;;  %v590_v47 = vadd.f32 %v1852_v45, %v549_v33  ;;  %v2052_v44 = vld [vmem:[%s2787_s11 + $0x78] ss:$28 sps:$4 sm:$0xff]  }
 0x11c   :  { %v2060_v45 = vld [vmem:[%s2787_s11 + $0xb4] ss:$28 sps:$4 sm:$0xff]  }
 0x11d   :  { %v631_v48 = vadd.f32 %v630_v36, %v590_v47  ;;  %v634_v49 = vmax.f32 %v628_v46, 0.0  ;;  %v2058_v46 = vld [vmem:[%s2787_s11 + $0xb0] ss:$28 sps:$4 sm:$0xff]  }
 0x11e   :  { %v2066_v47 = vld [vmem:[%s2787_s11 + $0xec] ss:$28 sps:$4 sm:$0xff]  }
 0x11f   :  { %v635_v50 = vmax.f32 %v631_v48, 0.0  ;;  %v2064_v48 = vld [vmem:[%s2787_s11 + $0xe8] ss:$28 sps:$4 sm:$0xff]  }
 0x121   :  { %v636_v51 = vpack.c.bf16 %v635_v50, %v634_v49  ;;  %v2072_v49 = vld [vmem:[%s2787_s11 + $0x124] ss:$28 sps:$4 sm:$0xff]  }
 0x122   :  { %v2070_v50 = vld [vmem:[%s2787_s11 + $0x120] ss:$28 sps:$4 sm:$0xff]  }
 0x123   :  { %1909 = vmatmul.mubr.bf16.vlgmr.msra.gmra.mrb[8].mxu1 %v636_v51  ;;  %v2075_v51 = vld [vmem:[%s2787_s11 + $0x154] ss:$28 sps:$4 sm:$0xff]  }
 0x124   :  { %1928 = vmatprep.mubr.msk.bf16.mxu1 %vm2198_vm0, %v2197_v43  ;;  %1925 = vmatpush3.bf16.msra.mxu1 %v2031_v0 }
 0x125   :  { %1926 = vmatprep.subr.bf16.mxu1 %v2197_v43 }
 0x128   :  { %1927 = vmatpush3.bf16.msra.mxu1 %v2032_v1 }
 0x129   :  { %1385 = vmatprep.subr.bf16.mxu1 %v2039_v17  ;;  %v2100_v17 = vld [vmem:[%s2787_s11 + $0xc0] ss:$28 sps:$4 sm:$0xff]  }
 0x1f6   :  { %v742_v55 = vpop.f32.mrb[8].mxu1 }
 0x1f7   :  { %v743_v56 = vadd.f32 %v1706_v54, %v742_v55  ;;  %v1910_v57 = vpop.f32.mrb[9].mxu1  ;;  %v2081_v55 = vld [vmem:[%s2787_s11 + $0x18c] ss:$28 sps:$4 sm:$0xff]  }
 0x1f8   :  { %v745_v58 = vpop.f32.mrb[10].mxu1  ;;  %v2079_v57 = vld [vmem:[%s2787_s11 + $0x188] ss:$28 sps:$4 sm:$0xff]  }
 0x1f9   :  { %v746_v59 = vadd.f32 %v1706_v54, %v745_v58  ;;  %v1911_v60 = vpop.f32.mrb[11].mxu1  ;;  %v749_v61 = vmax.f32 %v743_v56, 0.0  ;;  %v2076_v54 = vld [vmem:[%s2787_s11 + $0x158] ss:$28 sps:$4 sm:$0xff]   ;;  %v2082_v58 = vld [vmem:[%s2787_s11 + $0x190] ss:$28 sps:$4 sm:$0xff]  }
 0x1fa   :  { %v2084_v56 = vld [vmem:[%s2787_s11 + $0x194] ss:$28 sps:$4 sm:$0xff]   ;;  %v2199_v60 = vmov 0  }
 0x1fb   :  { %v750_v62 = vmax.f32 %v746_v59, 0.0  ;;  %v2087_v59 = vld [vmem:[%s2787_s11 + $0x14] ss:$28 sps:$4 sm:$0xff]  }
 0x1fd   :  { %v751_v63 = vpack.c.bf16 %v750_v62, %v749_v61  ;;  %v1725_v61 = vld [vmem:[%s2786_s10] ss:$0 sm:$0xff] }
 0x1ff   :  { %1921 = vmatmul.mubr.msk.bf16.vlgmr.msra.gmra.mrb[8].mxu0 %vm791_vm2, %v751_v63 }
 0x200   :  { %1940 = vmatprep.mubr.msk.bf16.mxu0 %vm2198_vm0, %v2197_v43  ;;  %1933 = vmatpush3.bf16.msra.mxu0 %v2033_v2 }
 0x201   :  { %1934 = vmatprep.subr.bf16.mxu0 %v2197_v43 }
 0x204   :  { %1935 = vmatpush3.bf16.msra.mxu0 %v2034_v3 }
 0x205   :  { %1936 = vmatprep.subr.bf16.mxu0 %v2197_v43 }
 0x208   :  { %1937 = vmatpush3.bf16.msra.mxu0 %v2035_v14  ;;  %v2096_v14 = vld [vmem:[%s2787_s11 + $0x88] ss:$28 sps:$4 sm:$0xff]  }
 0x209   :  { %1938 = vmatprep.subr.bf16.mxu0 %v2197_v43 }
 0x20c   :  { %1939 = vmatpush3.bf16.msra.mxu0 %v2036_v15  ;;  %v2099_v15 = vld [vmem:[%s2787_s11 + $0xbc] ss:$28 sps:$4 sm:$0xff]  }
 0x20d   :  { %1428 = vmatprep.subr.bf16.mxu0 %v2042_v18  ;;  %v2103_v18 = vld [vmem:[%s2787_s11 + $0xf4] ss:$28 sps:$4 sm:$0xff]  }
 0x2d2   :  { %v829_v5 = vpop.f32.mrb[8].mxu0 }
 0x2d3   :  { %v830_v6 = vadd.f32 %v1715_v4, %v829_v5  ;;  %v1922_v7 = vpop.f32.mrb[9].mxu0 }
 0x2d4   :  { %v832_v8 = vpop.f32.mrb[10].mxu0  ;;  %v2088_v7 = vld [vmem:[%s2787_s11 + $0x18] ss:$28 sps:$4 sm:$0xff]  }
 0x2d5   :  { %v833_v9 = vadd.f32 %v1715_v4, %v832_v8  ;;  %v1923_v10 = vpop.f32.mrb[11].mxu0  ;;  %v836_v11 = vmax.f32 %v830_v6, 0.0  ;;  %v2085_v6 = vld [vmem:[%s2787_s11 + $0x10] ss:$28 sps:$4 sm:$0xff]  }
 0x2d6   :  { %v2089_v10 = vld [vmem:[%s2787_s11 + $0x48] ss:$28 sps:$4 sm:$0xff]  }
 0x2d7   :  { %v837_v12 = vmax.f32 %v833_v9, 0.0  ;;  %v2091_v9 = vld [vmem:[%s2787_s11 + $0x4c] ss:$28 sps:$4 sm:$0xff]  }
 0x2d9   :  { %v838_v13 = vpack.c.bf16 %v837_v12, %v836_v11  ;;  %v2092_v11 = vld [vmem:[%s2787_s11 + $0x50] ss:$28 sps:$4 sm:$0xff]   ;;  %v2095_v12 = vld [vmem:[%s2787_s11 + $0x84] ss:$28 sps:$4 sm:$0xff]  }
 0x2db   :  { %1929 = vmatmul.mubr.msk.bf16.vlgmr.msra.gmra.mrb[12].mxu1 %vm862_vm3, %v838_v13  ;;  %v2093_v13 = vld [vmem:[%s2787_s11 + $0x80] ss:$28 sps:$4 sm:$0xff]  }
 0x2dc   :  { %1386 = vmatpush1.bf16.msra.mxu1 %v2037_v16  ;;  %1417 = vmatprep.mubr.bf16.mxu1 %v2199_v60  ;;  %v2097_v16 = vld [vmem:[%s2787_s11 + $0xb8] ss:$28 sps:$4 sm:$0xff]  }
 0x2dd   :  { %1387 = vmatprep.subr.bf16.mxu1 %v2045_v19  ;;  %v2101_v19 = vld [vmem:[%s2787_s11 + $0xf0] ss:$28 sps:$4 sm:$0xff]  }
 0x2e0   :  { %1388 = vmatpush1.bf16.msra.mxu1 %v2043_v20  ;;  %v2104_v20 = vld [vmem:[%s2787_s11 + $0xf8] ss:$28 sps:$4 sm:$0xff]  }
 0x2e1   :  { %1389 = vmatprep.subr.bf16.mxu1 %v2051_v21  ;;  %v2107_v21 = vld [vmem:[%s2787_s11 + $0x12c] ss:$28 sps:$4 sm:$0xff]  }
 0x2e4   :  { %1390 = vmatpush1.bf16.msra.mxu1 %v2049_v22  ;;  %v2105_v22 = vld [vmem:[%s2787_s11 + $0x128] ss:$28 sps:$4 sm:$0xff]  }
 0x2e5   :  { %1391 = vmatprep.subr.bf16.mxu1 %v2057_v23  ;;  %v2108_v23 = vld [vmem:[%s2787_s11 + $0x130] ss:$28 sps:$4 sm:$0xff]  }
 0x2e8   :  { %1392 = vmatpush1.bf16.msra.mxu1 %v2055_v24  ;;  %v2111_v24 = vld [vmem:[%s2787_s11 + $0x164] ss:$28 sps:$4 sm:$0xff]  }
 0x2e9   :  { %1393 = vmatprep.subr.bf16.mxu1 %v2063_v25  ;;  %v2109_v25 = vld [vmem:[%s2787_s11 + $0x160] ss:$28 sps:$4 sm:$0xff]  }
 0x2ec   :  { %1394 = vmatpush1.bf16.msra.mxu1 %v2061_v26  ;;  %v2112_v26 = vld [vmem:[%s2787_s11 + $0x168] ss:$28 sps:$4 sm:$0xff]  }
 0x2ed   :  { %1395 = vmatprep.subr.bf16.mxu1 %v2069_v27  ;;  %v2115_v27 = vld [vmem:[%s2787_s11 + $0x19c] ss:$28 sps:$4 sm:$0xff]  }
 0x2f0   :  { %1396 = vmatpush1.bf16.msra.mxu1 %v2067_v28  ;;  %v2113_v28 = vld [vmem:[%s2787_s11 + $0x198] ss:$28 sps:$4 sm:$0xff]  }
 0x2f1   :  { %1397 = vmatprep.subr.bf16.mxu1 %v2075_v51 }
 0x2f4   :  { %1398 = vmatpush1.bf16.msra.mxu1 %v2073_v53 }
 0x2f5   :  { %1399 = vmatprep.subr.bf16.mxu1 %v2081_v55 }
 0x2f8   :  { %1400 = vmatpush1.bf16.msra.mxu1 %v2079_v57 }
 0x2f9   :  { %1471 = vmatprep.subr.bf16.mxu1 %v2087_v59 }
 0x3ae   :  { %v900_v30 = vpop.f32.mrb[12].mxu1 }
 0x3af   :  { %v901_v31 = vadd.f32 %v1721_v29, %v900_v30  ;;  %v1930_v32 = vpop.f32.mrb[13].mxu1  ;;  %v1062_v30 = vlaneseq }
 0x3b0   :  { %v903_v33 = vpop.f32.mrb[14].mxu1 }
 0x3b1   :  { %v904_v34 = vadd.f32 %v1721_v29, %v903_v33  ;;  %v1931_v35 = vpop.f32.mrb[15].mxu1  ;;  %v907_v36 = vmax.f32 %v901_v31, 0.0  ;;  %v2116_v29 = vld [vmem:[%s2787_s11 + $0x1a0] ss:$28 sps:$4 sm:$0xff]   ;;  %v2741_v31 = vshrl.u32 %v1062_v30, 7  ;;  %s2200_s11 = smov [#allocation2]  }
 0x3b3   :  { %v908_v37 = vmax.f32 %v904_v34, 0.0  ;;  %v1064_v32 = vsub.s32 0, %v2741_v31  ;;  %v1072_v33 = vsub.s32 2, %v2741_v31  ;;  %v2748_v34 = vld [vmem:[%s2788_s12] sm:$0x7f]  ;;  %v1068_v35 = vsub.s32 1, %v2741_v31 }
 0x3b4   :  { %s1644_s12 = sshll.u32 %s2200_s11, 4  ;;  %s1645_s12 = int_to_ptr.vmem [resolvable:$true] %s1644_s12 }
 0x3b5   :  { %v909_v39 = vpack.c.bf16 %v908_v37, %v907_v36  ;;  %v1065_v36 = vrot.slane %v2748_v34, %v1064_v32  ;;  %v1073_v37 = vrot.slane %v2748_v34, %v1072_v33  ;;  %s2173_s9 = scalar_lea.vmem %s1645_s12, 1792  ;;  %p2178_p1 = scmp.lt.s32.totalorder %s1645_s12, %s1645_s12 }
 0x3b6   :  { %p2174_p0 = scmp.ne.s32.totalorder %s1645_s12, %s2173_s9  ;;  %p2179_p2 = scmp.lt.s32.totalorder %s2173_s9, %s2173_s9 }
 0x3b7   :  { %1941 = vmatmul.mubr.msk.bf16.vlgmr.msra.gmra.mrb[12].mxu0 %vm791_vm2, %v909_v39 }
 0x3b8   :  { %1429 = vmatpush1.bf16.msra.mxu0 %v2040_v38  ;;  %1460 = vmatprep.mubr.bf16.mxu0 %v2199_v60  ;;  %v1069_v38 = vrot.slane %v2748_v34, %v1068_v35  ;;  %p2180_p3 = por %p2179_p2, %p2178_p1 }
 0x3b9   :  { %1430 = vmatprep.subr.bf16.mxu0 %v2048_v40 }
 0x3ba   :  { %p2181_p4 = pnand %p2180_p3, %p2174_p0 }
 0x3bc   :  { %1431 = vmatpush1.bf16.msra.mxu0 %v2046_v41 }
 0x3bd   :  { %1432 = vmatprep.subr.bf16.mxu0 %v2054_v42 }
 0x3c0   :  { %1433 = vmatpush1.bf16.msra.mxu0 %v2052_v44 }
 0x3c1   :  { %1434 = vmatprep.subr.bf16.mxu0 %v2060_v45 }
 0x3c4   :  { %1435 = vmatpush1.bf16.msra.mxu0 %v2058_v46 }
 0x3c5   :  { %1436 = vmatprep.subr.bf16.mxu0 %v2066_v47 }
 0x3c8   :  { %1437 = vmatpush1.bf16.msra.mxu0 %v2064_v48 }
 0x3c9   :  { %1438 = vmatprep.subr.bf16.mxu0 %v2072_v49 }
 0x3cc   :  { %1439 = vmatpush1.bf16.msra.mxu0 %v2070_v50 }
 0x3cd   :  { %1440 = vmatprep.subr.bf16.mxu0 %v2078_v52 }
 0x3d0   :  { %1441 = vmatpush1.bf16.msra.mxu0 %v2076_v54 }
 0x3d1   :  { %1442 = vmatprep.subr.bf16.mxu0 %v2084_v56 }
 0x3d4   :  { %1443 = vmatpush1.bf16.msra.mxu0 %v2082_v58 }
 0x3d5   :  { %1944 = vmatprep.subr.bf16.mxu0 %v2197_v43 }
 0x48a   :  { %v986_v62 = vpop.f32.mrb[12].mxu0 }
 0x48b   :  { %v987_v63 = vadd.f32 %v1725_v61, %v986_v62  ;;  %v1942_v0 = vpop.f32.mrb[13].mxu0 }
 0x48c   :  { %v989_v1 = vpop.f32.mrb[14].mxu0 }
 0x48d   :  { %v990_v2 = vadd.f32 %v1725_v61, %v989_v1  ;;  %v1943_v3 = vpop.f32.mrb[15].mxu0  ;;  %v993_v4 = vmax.f32 %v987_v63, 0.0 }
 0x48f   :  { %v994_v5 = vmax.f32 %v990_v2, 0.0 }
 0x491   :  { %v995_v8 = vpack.c.bf16 %v994_v5, %v993_v4 }
 0x493   :  { %1418 = vmatmul.mubr.bf16.vlgmr.msra.gmra.mrb[16].mxu1 %v995_v8  ;;  %1461 = vmatmul.mubr.bf16.vlgmr.msra.gmra.mrb[16].mxu0 %v995_v8 }
 0x494   :  { %1472 = vmatpush1.bf16.msra.mxu1 %v2085_v6  ;;  %1945 = vmatpush3.bf16.msra.mxu0 %v2088_v7 }
 0x495   :  { %1473 = vmatprep.subr.bf16.mxu1 %v2091_v9  ;;  %1946 = vmatprep.subr.bf16.mxu0 %v2197_v43 }
 0x496   :  { %1503 = vmatprep.mubr.bf16.mxu1 %v2199_v60  ;;  %1960 = vmatprep.mubr.msk.bf16.mxu0 %vm2198_vm0, %v2197_v43 }
 0x498   :  { %1474 = vmatpush1.bf16.msra.mxu1 %v2089_v10  ;;  %1947 = vmatpush3.bf16.msra.mxu0 %v2092_v11 }
 0x499   :  { %1475 = vmatprep.subr.bf16.mxu1 %v2095_v12  ;;  %1948 = vmatprep.subr.bf16.mxu0 %v2197_v43 }
 0x49c   :  { %1476 = vmatpush1.bf16.msra.mxu1 %v2093_v13  ;;  %1949 = vmatpush3.bf16.msra.mxu0 %v2096_v14 }
 0x49d   :  { %1477 = vmatprep.subr.bf16.mxu1 %v2099_v15  ;;  %1950 = vmatprep.subr.bf16.mxu0 %v2197_v43 }
 0x4a0   :  { %1478 = vmatpush1.bf16.msra.mxu1 %v2097_v16  ;;  %1951 = vmatpush3.bf16.msra.mxu0 %v2100_v17 }
 0x4a1   :  { %1479 = vmatprep.subr.bf16.mxu1 %v2103_v18  ;;  %1952 = vmatprep.subr.bf16.mxu0 %v2197_v43 }
 0x4a4   :  { %1480 = vmatpush1.bf16.msra.mxu1 %v2101_v19  ;;  %1953 = vmatpush3.bf16.msra.mxu0 %v2104_v20 }
 0x4a5   :  { %1481 = vmatprep.subr.bf16.mxu1 %v2107_v21  ;;  %1954 = vmatprep.subr.bf16.mxu0 %v2197_v43 }
 0x4a8   :  { %1482 = vmatpush1.bf16.msra.mxu1 %v2105_v22  ;;  %1955 = vmatpush3.bf16.msra.mxu0 %v2108_v23 }
 0x4a9   :  { %1483 = vmatprep.subr.bf16.mxu1 %v2111_v24  ;;  %1956 = vmatprep.subr.bf16.mxu0 %v2197_v43 }
 0x4ac   :  { %1484 = vmatpush1.bf16.msra.mxu1 %v2109_v25  ;;  %1957 = vmatpush3.bf16.msra.mxu0 %v2112_v26  ;;  %v1080_v25 = vsub.s32 4, %v2741_v31  ;;  %v1088_v26 = vsub.s32 6, %v2741_v31 }
 0x4ad   :  { %1485 = vmatprep.subr.bf16.mxu1 %v2115_v27  ;;  %1958 = vmatprep.subr.bf16.mxu0 %v2197_v43  ;;  %v1076_v43 = vsub.s32 3, %v2741_v31  ;;  %v1084_v27 = vsub.s32 5, %v2741_v31 }
 0x4af   :  { %v1077_v39 = vrot.slane %v2748_v34, %v1076_v43  ;;  %v1085_v32 = vrot.slane %v2748_v34, %v1084_v27 }
 0x4b0   :  { %1486 = vmatpush1.bf16.msra.mxu1 %v2113_v28  ;;  %1959 = vmatpush3.bf16.msra.mxu0 %v2116_v29  ;;  %v1081_v28 = vrot.slane %v2748_v34, %v1080_v25  ;;  %v1089_v29 = vrot.slane %v2748_v34, %v1088_v26 }
 0x4b3   :  { %1504 = vmatmul.mubr.bf16.vlgmr.msra.gmra.mrb[20].mxu1 %v995_v8  ;;  %1961 = vmatmul.mubr.bf16.vlgmr.msra.gmra.mrb[20].mxu0 %v995_v8 }
 0x566   :  { %v1419_v40 = vpop.f32.mrb[16].mxu1  ;;  %v1462_v41 = vpop.f32.mrb[16].mxu0 }
 0x567   :  { %v1420_v42 = vadd.f32 %v1419_v40, %v1065_v36  ;;  %v1463_v44 = vadd.f32 %v1462_v41, %v1073_v37  ;;  %v1421_v45 = vpop.f32.mrb[17].mxu1  ;;  %v1464_v46 = vpop.f32.mrb[17].mxu0 }
 0x568   :  { %v1422_v47 = vadd.f32 %v1421_v45, %v1069_v38  ;;  %v1465_v48 = vadd.f32 %v1464_v46, %v1077_v39  ;;  %v1423_v49 = vpop.f32.mrb[18].mxu1  ;;  %v1466_v50 = vpop.f32.mrb[18].mxu0 }
 0x569   :  { %v1555_v51 = vsub.f32 0.0, %v1420_v42  ;;  %v1557_v52 = vsub.f32 0.0, %v1463_v44  ;;  %v1424_v53 = vadd.f32 %v1423_v49, %v1065_v36  ;;  %v1467_v54 = vadd.f32 %v1466_v50, %v1073_v37  ;;  %v1425_v55 = vpop.f32.mrb[19].mxu1  ;;  %v1468_v56 = vpop.f32.mrb[19].mxu0 }
 0x56a   :  { %v1556_v57 = vsub.f32 0.0, %v1422_v47  ;;  %v1558_v58 = vsub.f32 0.0, %v1465_v48  ;;  %v1426_v59 = vadd.f32 %v1425_v55, %v1069_v38  ;;  %v1469_v60 = vadd.f32 %v1468_v56, %v1077_v39 }
 0x56b   :  { %v1569_v61 = vmul.f32 1.442695, %v1555_v51  ;;  %v1573_v62 = vmul.f32 1.442695, %v1557_v52  ;;  %v1562_v63 = vsub.f32 0.0, %v1424_v53  ;;  %v1564_v0 = vsub.f32 0.0, %v1467_v54 }
 0x56c   :  { %v1571_v1 = vmul.f32 1.442695, %v1556_v57  ;;  %v1575_v2 = vmul.f32 1.442695, %v1558_v58  ;;  %v1563_v3 = vsub.f32 0.0, %v1426_v59  ;;  %v1565_v4 = vsub.f32 0.0, %v1469_v60 }
 0x56d   :  { %2117 = vpow2.f32 %v1569_v61  ;;  %v1583_v5 = vmul.f32 1.442695, %v1562_v63  ;;  %v1587_v6 = vmul.f32 1.442695, %v1564_v0 }
 0x56e   :  { %2119 = vpow2.f32 %v1573_v62  ;;  %v1585_v7 = vmul.f32 1.442695, %v1563_v3  ;;  %v1589_v8 = vmul.f32 1.442695, %v1565_v4 }
 0x56f   :  { %2121 = vpow2.f32 %v1571_v1 }
 0x570   :  { %2123 = vpow2.f32 %v1575_v2 }
 0x571   :  { %2125 = vpow2.f32 %v1583_v5 }
 0x572   :  { %2127 = vpow2.f32 %v1587_v6 }
 0x573   :  { %2129 = vpow2.f32 %v1585_v7 }
 0x574   :  { %2131 = vpow2.f32 %v1589_v8 }
 0x577   :  { %v2118_v9 = vpop.eup %2117 }
 0x578   :  { %v2120_v10 = vpop.eup %2119  ;;  %v1597_v11 = vadd.f32 1.0, %v2118_v9 }
 0x579   :  { %v2122_v12 = vpop.eup %2121  ;;  %v1599_v13 = vadd.f32 1.0, %v2120_v10 }
 0x57a   :  { %v2124_v14 = vpop.eup %2123  ;;  %2133 = vrcp.f32 %v1597_v11  ;;  %v1598_v15 = vadd.f32 1.0, %v2122_v12 }
 0x57b   :  { %v2126_v16 = vpop.eup %2125  ;;  %2135 = vrcp.f32 %v1599_v13  ;;  %v1600_v17 = vadd.f32 1.0, %v2124_v14 }
 0x57c   :  { %v2128_v18 = vpop.eup %2127  ;;  %2137 = vrcp.f32 %v1598_v15  ;;  %v1604_v19 = vadd.f32 1.0, %v2126_v16 }
 0x57d   :  { %v2130_v20 = vpop.eup %2129  ;;  %2139 = vrcp.f32 %v1600_v17  ;;  %v1606_v21 = vadd.f32 1.0, %v2128_v18 }
 0x57e   :  { %v2132_v22 = vpop.eup %2131  ;;  %2141 = vrcp.f32 %v1604_v19  ;;  %v1605_v23 = vadd.f32 1.0, %v2130_v20 }
 0x57f   :  { %2143 = vrcp.f32 %v1606_v21  ;;  %v1607_v24 = vadd.f32 1.0, %v2132_v22 }
 0x580   :  { %2145 = vrcp.f32 %v1605_v23 }
 0x581   :  { %2147 = vrcp.f32 %v1607_v24 }
 0x584   :  { %v2134_v30 = vpop.eup %2133 }
 0x585   :  { %v2136_v33 = vpop.eup %2135  ;;  %1625 = vst [vmem:[#allocation2] sm:$0xff] %v2134_v30 }
 0x586   :  { %v2138_v35 = vpop.eup %2137  ;;  %1627 = vst [vmem:[#allocation2 + $0x10] sm:$0xff] %v2136_v33  ;;  %v1505_v43 = vpop.f32.mrb[20].mxu1 }
 0x587   :  { %v1548_v36 = vpop.f32.mrb[20].mxu0  ;;  %v2140_v37 = vpop.eup %2139  ;;  %1626 = vst [vmem:[#allocation2 + $0x8] sm:$0xff] %v2138_v35  ;;  %v1506_v38 = vadd.f32 %v1505_v43, %v1081_v28 }
 0x588   :  { %v1549_v39 = vadd.f32 %v1548_v36, %v1089_v29  ;;  %v1507_v40 = vpop.f32.mrb[21].mxu1  ;;  %v1962_v31 = vpop.f32.mrb[21].mxu0  ;;  %1628 = vst [vmem:[#allocation2 + $0x18] sm:$0xff] %v2140_v37 }
 0x589   :  { %v2142_v41 = vpop.eup %2141  ;;  %v1508_v42 = vadd.f32 %v1507_v40, %v1085_v32  ;;  %v1509_v44 = vpop.f32.mrb[22].mxu1  ;;  %v1559_v34 = vsub.f32 0.0, %v1506_v38 }
 0x58a   :  { %v1551_v45 = vpop.f32.mrb[22].mxu0  ;;  %v2144_v46 = vpop.eup %2143  ;;  %1632 = vst [vmem:[#allocation2 + $0x38] sm:$0xff] %v2142_v41  ;;  %v1561_v47 = vsub.f32 0.0, %v1549_v39  ;;  %v1510_v48 = vadd.f32 %v1509_v44, %v1081_v28 }
 0x58b   :  { %v1552_v49 = vadd.f32 %v1551_v45, %v1089_v29  ;;  %v1511_v50 = vpop.f32.mrb[23].mxu1  ;;  %v1963_v51 = vpop.f32.mrb[23].mxu0  ;;  %1634 = vst [vmem:[#allocation2 + $0x48] sm:$0xff] %v2144_v46  ;;  %v1560_v53 = vsub.f32 0.0, %v1508_v42  ;;  %v1577_v56 = vmul.f32 1.442695, %v1559_v34 }
 0x58c   :  { %v2146_v52 = vpop.eup %2145  ;;  %v1512_v54 = vadd.f32 %v1511_v50, %v1085_v32  ;;  %v1581_v57 = vmul.f32 1.442695, %v1561_v47  ;;  %v1566_v58 = vsub.f32 0.0, %v1510_v48 }
 0x58d   :  { %v2148_v55 = vpop.eup %2147  ;;  %1633 = vst [vmem:[#allocation2 + $0x40] sm:$0xff] %v2146_v52  ;;  %v1568_v59 = vsub.f32 0.0, %v1552_v49  ;;  %v1579_v60 = vmul.f32 1.442695, %v1560_v53  ;;  %2149 = vpow2.f32 %v1577_v56 }
 0x58e   :  { %1635 = vst [vmem:[#allocation2 + $0x50] sm:$0xff] %v2148_v55  ;;  %v1567_v61 = vsub.f32 0.0, %v1512_v54  ;;  %v1591_v62 = vmul.f32 1.442695, %v1566_v58  ;;  %2151 = vpow2.f32 %v1581_v57 }
 0x58f   :  { %v1595_v63 = vmul.f32 1.442695, %v1568_v59  ;;  %2153 = vpow2.f32 %v1579_v60 }
 0x590   :  { %v1593_v0 = vmul.f32 1.442695, %v1567_v61  ;;  %2155 = vpow2.f32 %v1591_v62 }
 0x591   :  { %2157 = vpow2.f32 %v1595_v63 }
 0x592   :  { %2159 = vpow2.f32 %v1593_v0 }
 0x597   :  { %v2150_v1 = vpop.eup %2149 }
 0x598   :  { %v2152_v2 = vpop.eup %2151  ;;  %v1601_v3 = vadd.f32 1.0, %v2150_v1 }
 0x599   :  { %v2154_v4 = vpop.eup %2153  ;;  %v1603_v5 = vadd.f32 1.0, %v2152_v2 }
 0x59a   :  { %v2156_v6 = vpop.eup %2155  ;;  %2161 = vrcp.f32 %v1601_v3  ;;  %v1602_v7 = vadd.f32 1.0, %v2154_v4 }
 0x59b   :  { %v2158_v8 = vpop.eup %2157  ;;  %2163 = vrcp.f32 %v1603_v5  ;;  %v1608_v9 = vadd.f32 1.0, %v2156_v6 }
 0x59c   :  { %v2160_v10 = vpop.eup %2159  ;;  %2165 = vrcp.f32 %v1602_v7  ;;  %v1610_v11 = vadd.f32 1.0, %v2158_v8 }
 0x59d   :  { %2167 = vrcp.f32 %v1608_v9  ;;  %v1609_v12 = vadd.f32 1.0, %v2160_v10 }
 0x59e   :  { %2169 = vrcp.f32 %v1610_v11 }
 0x59f   :  { %2171 = vrcp.f32 %v1609_v12 }
 0x5a4   :  { %v2162_v13 = vpop.eup %2161 }
 0x5a5   :  { %v2164_v14 = vpop.eup %2163  ;;  %1629 = vst [vmem:[#allocation2 + $0x20] sm:$0xff] %v2162_v13 }
 0x5a6   :  { %v2166_v15 = vpop.eup %2165  ;;  %1631 = vst.msk [vmem:[#allocation2 + $0x30] sm:$0xff] %vm466_vm1, %v2164_v14 }
 0x5a7   :  { %v2168_v16 = vpop.eup %2167  ;;  %1630 = vst [vmem:[#allocation2 + $0x28] sm:$0xff] %v2166_v15 }
 0x5a8   :  { %v2170_v17 = vpop.eup %2169  ;;  %1636 = vst [vmem:[#allocation2 + $0x58] sm:$0xff] %v2168_v16 }
 0x5a9   :  { %v2172_v18 = vpop.eup %2171  ;;  %1638 = vst.msk [vmem:[#allocation2 + $0x68] sm:$0xff] %vm466_vm1, %v2170_v17 }
 0x5aa   :  { %1637 = vst [vmem:[#allocation2 + $0x60] sm:$0xff] %v2172_v18 }
 0x5ab   :  { %2184 = shalt.err (!%p2181_p4)
}
 0x5ac   :  { %s2185_s19 = scalar_lea.hbm %s2789_s13, 1792 }
 0x5ad   :  { %p2186_p5 = scmp.ne.s32.totalorder %s2789_s13, %s2185_s19  ;;  %p2189_p6 = scmp.lt.u32.totalorder %s2185_s19, %s2789_s13 }
 0x5af   :  { %p2191_p7 = pnand %p2189_p6, %p2186_p5 }
 0x5b1   :  { %2194 = shalt.err (!%p2191_p7)
}
 0x5b2   :  { %s2201_s22 = smov 896   ;;  %s2202_s23 = smov 56  }
 0x5b3   :  { %1650 = dma.vmem_to_hbm [thread:$0]  %s1645_s12, 1792, %s2789_s13, [#allocation3], %s2201_s22, %s2201_s22, %s2202_s23  }
 0x5b4   :  { %2195 = dma.done.wait [#allocation3], 1792  }
 0x5b5   :  { %2196 = vsyncadd [#allocation3], 4294965504 }
 0x5b6   :  { %1654 = vsyncpa [#allocation3], 1 }

</bundles_post_ra>
